<compile_context>
chip_gen: v7x
topology: tpu7x:2x2x1
jax: 0.10.0
libtpu: 0.0.40
codegen_flags: <defaults>
</compile_context>

<pallas_src>
import functools
import math

import jax
import jax.numpy as jnp
from jax.experimental import pallas as pl
from jax.experimental.pallas import tpu as pltpu

_TM_MAX = 256                 # max row tile for the im2col matmuls
_VMEM_LIMIT = 40 << 20        # safe on v5e/v6e (128 MiB) and v7x (64 MiB)
_BN_EPS = 1e-5


def _round_up(x, m):
    return ((x + m - 1) // m) * m


def _row_tile(m):
    """Pick a row tile: 256 for big M, else the (16-aligned) full M."""
    if m >= _TM_MAX:
        tm = _TM_MAX
    else:
        tm = _round_up(m, 16)
    return tm, _round_up(m, tm)


# ----------------------------- Pallas kernels ------------------------------ #

def _conv_bias_kernel(p_ref, w_ref, b_ref, y_ref):
    # p_ref: (TM, K) bf16   w_ref: (K, Cout) bf16   b_ref: (1, Cout) f32
    acc = jnp.dot(p_ref[...], w_ref[...], preferred_element_type=jnp.float32)
    acc = acc + b_ref[...]
    y_ref[...] = acc.astype(y_ref.dtype)


def _conv_bias_stats_kernel(p_ref, w_ref, b_ref, y_ref, s_ref, *, m_valid, tm):
    # Conv + bias, plus fused per-channel (sum, sum-of-squares) reduction for
    # training-mode BatchNorm.  s_ref: (2, Cout) f32 accumulator revisited
    # across the (sequential, "arbitrary") row-tile grid axis.
    i = pl.program_id(0)
    acc = jnp.dot(p_ref[...], w_ref[...], preferred_element_type=jnp.float32)
    acc = acc + b_ref[...]
    y_ref[...] = acc.astype(y_ref.dtype)

    # Mask out padded rows so they do not pollute the statistics.
    row = i * tm + jax.lax.broadcasted_iota(jnp.int32, acc.shape, 0)
    valid = (row < m_valid).astype(jnp.float32)
    av = acc * valid
    part = jnp.concatenate(
        [jnp.sum(av, axis=0, keepdims=True),
         jnp.sum(av * acc, axis=0, keepdims=True)], axis=0)

    @pl.when(i == 0)
    def _():
        s_ref[...] = jnp.zeros_like(s_ref)

    s_ref[...] += part


def _affine_relu_kernel(y_ref, sc_ref, sh_ref, o_ref):
    # BatchNorm fold (y * scale + shift) + ReLU, tiled over rows.
    y = y_ref[...].astype(jnp.float32)
    o = jnp.maximum(y * sc_ref[...] + sh_ref[...], 0.0)
    o_ref[...] = o.astype(o_ref.dtype)


def _max4_kernel(a_ref, b_ref, c_ref, d_ref, o_ref):
    o_ref[...] = jnp.maximum(jnp.maximum(a_ref[...], b_ref[...]),
                             jnp.maximum(c_ref[...], d_ref[...]))


# ------------------------------ Pallas wrappers ----------------------------- #

def _conv_matmul(patches, w2, bias, *, out_dtype, with_stats, m_valid):
    """(M, K) @ (K, Cout) + bias on the MXU (bf16 in, f32 acc).

    Returns the row-padded output (and the (2, Cout) stats when requested)."""
    m, k = patches.shape
    cout = w2.shape[1]
    tm, mpad = _row_tile(m)
    if mpad != m:
        patches = jnp.pad(patches, ((0, mpad - m), (0, 0)))
    grid = (mpad // tm,)
    b2 = bias.reshape(1, cout).astype(jnp.float32)

    bytes_accessed = int(mpad * k * 2 + k * cout * 2
                         + mpad * cout * jnp.dtype(out_dtype).itemsize)
    cost = pl.CostEstimate(flops=2 * m * k * cout, transcendentals=0,
                           bytes_accessed=bytes_accessed)

    in_specs = [
        pl.BlockSpec((tm, k), lambda i: (i, 0)),
        pl.BlockSpec((k, cout), lambda i: (0, 0)),
        pl.BlockSpec((1, cout), lambda i: (0, 0)),
    ]

    if with_stats:
        kernel = functools.partial(_conv_bias_stats_kernel, m_valid=m_valid, tm=tm)
        out_shape = (jax.ShapeDtypeStruct((mpad, cout), out_dtype),
                     jax.ShapeDtypeStruct((2, cout), jnp.float32))
        out_specs = (pl.BlockSpec((tm, cout), lambda i: (i, 0)),
                     pl.BlockSpec((2, cout), lambda i: (0, 0)))
        semantics = ("arbitrary",)     # stats accumulator is revisited -> sequential
    else:
        kernel = _conv_bias_kernel
        out_shape = jax.ShapeDtypeStruct((mpad, cout), out_dtype)
        out_specs = pl.BlockSpec((tm, cout), lambda i: (i, 0))
        semantics = ("parallel",)

    return pl.pallas_call(
        kernel,
        out_shape=out_shape,
        grid=grid,
        in_specs=in_specs,
        out_specs=out_specs,
        compiler_params=pltpu.CompilerParams(
            dimension_semantics=semantics,
            vmem_limit_bytes=_VMEM_LIMIT),
        cost_estimate=cost,
    )(patches, w2, b2)


def _affine_relu(y_pad, scale, shift, tm, out_dtype=jnp.bfloat16):
    mpad, c = y_pad.shape
    return pl.pallas_call(
        _affine_relu_kernel,
        out_shape=jax.ShapeDtypeStruct((mpad, c), out_dtype),
        grid=(mpad // tm,),
        in_specs=[
            pl.BlockSpec((tm, c), lambda i: (i, 0)),
            pl.BlockSpec((1, c), lambda i: (0, 0)),
            pl.BlockSpec((1, c), lambda i: (0, 0)),
        ],
        out_specs=pl.BlockSpec((tm, c), lambda i: (i, 0)),
        compiler_params=pltpu.CompilerParams(
            dimension_semantics=("parallel",),
            vmem_limit_bytes=_VMEM_LIMIT),
    )(y_pad, scale.reshape(1, c).astype(jnp.float32),
      shift.reshape(1, c).astype(jnp.float32))


# ------------------------------ Layer building blocks ----------------------- #

def _im2col(x, k, stride, pad):
    # x: (N, H, W, C) -> patches (N*Ho*Wo, k*k*C), patch ordering (kh, kw, cin)
    n, h, w, c = x.shape
    xp = jnp.pad(x, ((0, 0), (pad, pad), (pad, pad), (0, 0)))
    ho = (h + 2 * pad - k) // stride + 1
    wo = (w + 2 * pad - k) // stride + 1
    cols = []
    for di in range(k):
        for dj in range(k):
            cols.append(
                xp[:, di:di + stride * ho:stride, dj:dj + stride * wo:stride, :])
    p = jnp.concatenate(cols, axis=-1)              # (N, Ho, Wo, k*k*C)
    return p.reshape(n * ho * wo, k * k * c), (n, ho, wo)


def conv3x3_bn_relu(x, w, b, gamma, beta):
    """Conv2d(3x3, pad=1) -> BatchNorm2d (batch stats) -> ReLU, NHWC, bf16 out."""
    cout = w.shape[-1]
    patches, (n, ho, wo) = _im2col(x.astype(jnp.bfloat16), 3, 1, 1)
    m = patches.shape[0]
    tm, _ = _row_tile(m)

    w2 = w.reshape(-1, cout).astype(jnp.bfloat16)
    y_pad, stats = _conv_matmul(patches, w2, b, out_dtype=jnp.bfloat16,
                                with_stats=True, m_valid=m)

    mean = stats[0] / m
    var = jnp.maximum(stats[1] / m - mean * mean, 0.0)   # biased var (training fwd)
    scale = gamma * jax.lax.rsqrt(var + _BN_EPS)
    shift = beta - mean * scale

    out_pad = _affine_relu(y_pad, scale, shift, tm)
    return out_pad[:m].reshape(n, ho, wo, cout)


def conv1x1(x, w, b, out_dtype=jnp.float32):
    """Conv2d(1x1).  w: (Cin, Cout)."""
    n, h, wdt, cin = x.shape
    cout = w.shape[-1]
    m = n * h * wdt
    y_pad = _conv_matmul(x.reshape(m, cin).astype(jnp.bfloat16),
                         w.astype(jnp.bfloat16), b, out_dtype=out_dtype,
                         with_stats=False, m_valid=m)
    return y_pad[:m].reshape(n, h, wdt, cout)


def upconv2x2_transpose(x, w, b):
    """ConvTranspose2d(kernel=2, stride=2) as a per-pixel matmul.
    w: (Cin, 2, 2, Cout)."""
    n, h, wdt, cin = x.shape
    cout = w.shape[-1]
    m = n * h * wdt
    w2 = w.reshape(cin, 4 * cout).astype(jnp.bfloat16)
    b2 = jnp.tile(b, 4)                              # bias per (di, dj, cout) column
    y_pad = _conv_matmul(x.reshape(m, cin).astype(jnp.bfloat16), w2, b2,
                         out_dtype=jnp.bfloat16, with_stats=False, m_valid=m)
    y = y_pad[:m].reshape(n, h, wdt, 2, 2, cout)
    y = jnp.transpose(y, (0, 1, 3, 2, 4, 5)).reshape(n, 2 * h, 2 * wdt, cout)
    return y


def maxpool2x2(x):
    """MaxPool2d(kernel=2, stride=2) in NHWC."""
    n, h, w, c = x.shape
    ho, wo = h // 2, w // 2
    a = x[:, 0::2, 0::2, :].reshape(-1, c)
    b = x[:, 0::2, 1::2, :].reshape(-1, c)
    cc = x[:, 1::2, 0::2, :].reshape(-1, c)
    d = x[:, 1::2, 1::2, :].reshape(-1, c)
    m = n * ho * wo
    tm, mpad = _row_tile(m)
    if mpad != m:
        pads = ((0, mpad - m), (0, 0))
        a, b, cc, d = (jnp.pad(t, pads) for t in (a, b, cc, d))
    out = pl.pallas_call(
        _max4_kernel,
        out_shape=jax.ShapeDtypeStruct((mpad, c), x.dtype),
        grid=(mpad // tm,),
        in_specs=[pl.BlockSpec((tm, c), lambda i: (i, 0))] * 4,
        out_specs=pl.BlockSpec((tm, c), lambda i: (i, 0)),
        compiler_params=pltpu.CompilerParams(
            dimension_semantics=("parallel",),
            vmem_limit_bytes=_VMEM_LIMIT),
    )(a, b, cc, d)
    return out[:m].reshape(n, ho, wo, c)


# ----------------------------- Model wrapper ------------------------------- #

def init_unet_params(key, *, in_channels, out_channels, num_classes, depth,
                     start_filts, combine, flag, merge_mode):
    def xavier_conv(k, kh, kw, cin, cout):
        std = math.sqrt(2.0 / ((cin + cout) * kh * kw))
        return std * jax.random.normal(k, (kh, kw, cin, cout), jnp.float32)

    def xavier_1x1(k, cin, cout):
        std = math.sqrt(2.0 / (cin + cout))
        return std * jax.random.normal(k, (cin, cout), jnp.float32)

    params = {"down": [], "up1": [], "up2": []}
    outs = in_channels
    for i in range(depth):
        ins = in_channels if i == 0 else outs
        outs = start_filts * (2 ** i)
        key, k1, k2 = jax.random.split(key, 3)
        params["down"].append({
            "w1": xavier_conv(k1, 3, 3, ins, outs),
            "b1": jnp.zeros((outs,), jnp.float32),
            "w2": xavier_conv(k2, 3, 3, outs, outs),
            "b2": jnp.zeros((outs,), jnp.float32),
            "g": jnp.ones((outs,), jnp.float32),
            "be": jnp.zeros((outs,), jnp.float32),
        })

    branches = ["up1"] + (["up2"] if combine else [])
    for _ in range(depth - 1):
        ins = outs
        outs = ins // 2
        c1_in = 2 * outs if merge_mode == "concat" else outs
        for br in branches:
            key, kt, kb, k1, k2 = jax.random.split(key, 5)
            bound = 1.0 / math.sqrt(ins * 4)
            params[br].append({
                "wt": jax.random.uniform(kt, (ins, 2, 2, outs), jnp.float32,
                                         -bound, bound),
                "bt": jax.random.uniform(kb, (outs,), jnp.float32, -bound, bound),
                "w1": xavier_conv(k1, 3, 3, c1_in, outs),
                "b1": jnp.zeros((outs,), jnp.float32),
                "w2": xavier_conv(k2, 3, 3, outs, outs),
                "b2": jnp.zeros((outs,), jnp.float32),
                "g": jnp.ones((outs,), jnp.float32),
                "be": jnp.zeros((outs,), jnp.float32),
            })

    if combine:
        key, ks, ki = jax.random.split(key, 3)
        params["wf_seg"] = xavier_1x1(ks, outs, num_classes * out_channels)
        params["bf_seg"] = jnp.zeros((num_classes * out_channels,), jnp.float32)
        params["wf_img"] = xavier_1x1(ki, outs, out_channels)
        params["bf_img"] = jnp.zeros((out_channels,), jnp.float32)
    else:
        key, kf = jax.random.split(key)
        cf = num_classes * out_channels if flag else out_channels
        params["wf"] = xavier_1x1(kf, outs, cf)
        params["bf"] = jnp.zeros((cf,), jnp.float32)
    return params


def unet_deep_forward(x_nchw, params, *, depth=3, merge_mode="concat",
                      combine=False, flag=False, num_classes=4):
    img_shape = x_nchw.shape                          # (N, C, H, W)
    x = jnp.transpose(x_nchw, (0, 2, 3, 1)).astype(jnp.bfloat16)   # NCHW -> NHWC

    encoder_outs = []
    y = None
    # ---------------- encoder ----------------
    for i, blk in enumerate(params["down"]):
        pooling = i < depth - 1
        x = conv3x3_bn_relu(x, blk["w1"], blk["b1"], blk["g"], blk["be"])
        x = conv3x3_bn_relu(x, blk["w2"], blk["b2"], blk["g"], blk["be"])
        encoder_outs.append(x)                        # before_pool
        if pooling:
            x = maxpool2x2(x)
        if combine:
            y = x

    # ---------------- decoder ----------------
    def decode(h, blocks):
        for i, blk in enumerate(blocks):
            from_down = encoder_outs[-(i + 2)]
            up = upconv2x2_transpose(h, blk["wt"], blk["bt"])
            if merge_mode == "concat":
                h = jnp.concatenate([up, from_down], axis=-1)
            else:
                h = up + from_down
            h = conv3x3_bn_relu(h, blk["w1"], blk["b1"], blk["g"], blk["be"])
            h = conv3x3_bn_relu(h, blk["w2"], blk["b2"], blk["g"], blk["be"])
        return h

    x = decode(x, params["up1"])

    if combine:
        y = decode(y, params["up2"])
        y = conv1x1(y, params["wf_seg"], params["bf_seg"])
        y = jnp.transpose(y, (0, 3, 1, 2)).reshape(
            1, num_classes, img_shape[1], img_shape[2], img_shape[3])
        x = conv1x1(x, params["wf_img"], params["bf_img"])
        x = jnp.transpose(x, (0, 3, 1, 2))
        return x, y

    x = conv1x1(x, params["wf"], params["bf"])
    x = jnp.transpose(x, (0, 3, 1, 2))                # NHWC -> NCHW
    if flag:
        x = x.reshape(1, num_classes, img_shape[1], img_shape[2], img_shape[3])
    return x


if __name__ == "__main__":
    key = jax.random.PRNGKey(0)
    k_params, k_input = jax.random.split(key)

    cfg = dict(in_channels=4, out_channels=4, num_classes=4, depth=3,
               start_filts=8, combine=False, flag=False, merge_mode="concat")
    params = init_unet_params(k_params, **cfg)

    batch, spatial = 2, 16
    x = jax.random.normal(k_input, (batch, cfg["in_channels"], spatial, spatial),
                          jnp.float32)

    out = unet_deep_forward(x, params, depth=cfg["depth"],
                            merge_mode=cfg["merge_mode"],
                            combine=cfg["combine"], flag=cfg["flag"],
                            num_classes=cfg["num_classes"])
    out = jax.block_until_ready(out)

    assert out.shape == (batch, cfg["out_channels"], spatial, spatial), out.shape
    assert bool(jnp.all(jnp.isfinite(out.astype(jnp.float32))))
    print("KERNEL_OK")
</pallas_src>

<mosaic_0001>
module attributes {stable_mosaic.version = 11 : i64} {
  func.func @_conv_bias_stats_kernel(%arg0: i32, %arg1: memref<256x36xbf16, #tpu.memory_space<vmem>>, %arg2: memref<36x8xbf16, #tpu.memory_space<vmem>>, %arg3: memref<1x8xf32, #tpu.memory_space<vmem>>, %arg4: memref<256x8xbf16, #tpu.memory_space<vmem>>, %arg5: memref<2x8xf32, #tpu.memory_space<vmem>>) attributes {dimension_semantics = [#tpu.dimension_semantics<arbitrary>], iteration_bounds = array<i64: 2>, scalar_prefetch = 0 : i64, scratch_operands = 0 : i64, tpu.core_type = #tpu.core_type<tc>, window_params = [{transform_indices = @transform_0, window_bounds = array<i64: 256, 36>}, {pipeline_mode = #tpu.pipeline_mode<synchronous>, transform_indices = @transform_1, window_bounds = array<i64: 36, 8>}, {pipeline_mode = #tpu.pipeline_mode<synchronous>, transform_indices = @transform_2, window_bounds = array<i64: 1, 8>}, {transform_indices = @transform_3, window_bounds = array<i64: 256, 8>}, {pipeline_mode = #tpu.pipeline_mode<synchronous>, transform_indices = @transform_4, window_bounds = array<i64: 2, 8>}]} {
    %c0 = arith.constant 0 : index
    %c0_0 = arith.constant 0 : index
    %0 = vector.load %arg1[%c0, %c0_0] : memref<256x36xbf16, #tpu.memory_space<vmem>>, vector<256x36xbf16>
    %c0_1 = arith.constant 0 : index
    %c0_2 = arith.constant 0 : index
    %1 = vector.load %arg2[%c0_1, %c0_2] : memref<36x8xbf16, #tpu.memory_space<vmem>>, vector<36x8xbf16>
    %cst = arith.constant dense<0.000000e+00> : vector<256x8xf32>
    %2 = tpu.matmul %0, %1, %cst {dimension_numbers = #tpu.dot_dimension_numbers<[1], [0], [0], [1], [0, 0, 1, 1], [], []>} : vector<256x36xbf16>, vector<36x8xbf16>, vector<256x8xf32> -> vector<256x8xf32>
    %c0_3 = arith.constant 0 : index
    %c0_4 = arith.constant 0 : index
    %3 = vector.load %arg3[%c0_3, %c0_4] : memref<1x8xf32, #tpu.memory_space<vmem>>, vector<1x8xf32>
    %4 = vector.broadcast %3 : vector<1x8xf32> to vector<256x8xf32>
    %5 = arith.addf %2, %4 : vector<256x8xf32>
    %6 = arith.truncf %5 : vector<256x8xf32> to vector<256x8xbf16>
    %c0_5 = arith.constant 0 : index
    %c0_6 = arith.constant 0 : index
    %7 = vector.load %arg4[%c0_5, %c0_6] : memref<256x8xbf16, #tpu.memory_space<vmem>>, vector<256x8xbf16>
    tpu.vector_store %arg4[%c0_5, %c0_6], %6 {strides = array<i32>} : memref<256x8xbf16, #tpu.memory_space<vmem>>, vector<256x8xbf16>,
    %c256_i32 = arith.constant 256 : i32
    %8 = arith.muli %arg0, %c256_i32 : i32
    %9 = tpu.iota {dimensions = array<i32: 0>} : vector<256x8xi32>
    %10 = vector.broadcast %8 : i32 to vector<256x8xi32>
    %11 = arith.addi %10, %9 : vector<256x8xi32>
    %c512_i32 = arith.constant 512 : i32
    %12 = vector.broadcast %c512_i32 : i32 to vector<256x8xi32>
    %13 = arith.cmpi slt, %11, %12 : vector<256x8xi32>
    %14 = arith.extui %13 : vector<256x8xi1> to vector<256x8xi32>
    %15 = arith.sitofp %14 : vector<256x8xi32> to vector<256x8xf32>
    %16 = arith.mulf %5, %15 : vector<256x8xf32>
    %cst_7 = arith.constant dense<0.000000e+00> : vector<8xf32>
    %17 = vector.multi_reduction <add>, %16, %cst_7 [0] : vector<256x8xf32> to vector<8xf32>
    %18 = vector.shape_cast %17 : vector<8xf32> to vector<1x8xf32>
    %19 = arith.mulf %16, %5 : vector<256x8xf32>
    %cst_8 = arith.constant dense<0.000000e+00> : vector<8xf32>
    %20 = vector.multi_reduction <add>, %19, %cst_8 [0] : vector<256x8xf32> to vector<8xf32>
    %21 = vector.shape_cast %20 : vector<8xf32> to vector<1x8xf32>
    %22 = tpu.concatenate %18, %21 in 0 : vector<1x8xf32>, vector<1x8xf32> -> vector<2x8xf32>
    %c0_i32 = arith.constant 0 : i32
    %23 = arith.cmpi eq, %arg0, %c0_i32 : i32
    %24 = arith.extui %23 : i1 to i32
    %c0_i32_9 = arith.constant 0 : i32
    %25 = arith.cmpi ne, %24, %c0_i32_9 : i32
    scf.if %25 {
      %cst_14 = arith.constant 0.000000e+00 : f32
      %29 = vector.broadcast %cst_14 : f32 to vector<2x8xf32>
      %c0_15 = arith.constant 0 : index
      %c0_16 = arith.constant 0 : index
      %30 = vector.load %arg5[%c0_15, %c0_16] : memref<2x8xf32, #tpu.memory_space<vmem>>, vector<2x8xf32>
      tpu.vector_store %arg5[%c0_15, %c0_16], %29 {strides = array<i32>} : memref<2x8xf32, #tpu.memory_space<vmem>>, vector<2x8xf32>,
    } else {
    }
    %c0_10 = arith.constant 0 : index
    %c0_11 = arith.constant 0 : index
    %26 = vector.load %arg5[%c0_10, %c0_11] : memref<2x8xf32, #tpu.memory_space<vmem>>, vector<2x8xf32>
    %27 = arith.addf %26, %22 : vector<2x8xf32>
    %c0_12 = arith.constant 0 : index
    %c0_13 = arith.constant 0 : index
    %28 = vector.load %arg5[%c0_12, %c0_13] : memref<2x8xf32, #tpu.memory_space<vmem>>, vector<2x8xf32>
    tpu.vector_store %arg5[%c0_12, %c0_13], %27 {strides = array<i32>} : memref<2x8xf32, #tpu.memory_space<vmem>>, vector<2x8xf32>,
    return
  }
  func.func @transform_0(%arg0: i32) -> (i32, i32) {
    %c0_i32 = arith.constant 0 : i32
    %c0_i32_0 = arith.constant 0 : i32
    return %arg0, %c0_i32 : i32, i32
  }
  func.func @transform_1(%arg0: i32) -> (i32, i32) {
    %c0_i32 = arith.constant 0 : i32
    %c0_i32_0 = arith.constant 0 : i32
    %c0_i32_1 = arith.constant 0 : i32
    return %c0_i32, %c0_i32_0 : i32, i32
  }
  func.func @transform_2(%arg0: i32) -> (i32, i32) {
    %c0_i32 = arith.constant 0 : i32
    %c0_i32_0 = arith.constant 0 : i32
    %c0_i32_1 = arith.constant 0 : i32
    return %c0_i32, %c0_i32_0 : i32, i32
  }
  func.func @transform_3(%arg0: i32) -> (i32, i32) {
    %c0_i32 = arith.constant 0 : i32
    %c0_i32_0 = arith.constant 0 : i32
    return %arg0, %c0_i32 : i32, i32
  }
  func.func @transform_4(%arg0: i32) -> (i32, i32) {
    %c0_i32 = arith.constant 0 : i32
    %c0_i32_0 = arith.constant 0 : i32
    %c0_i32_1 = arith.constant 0 : i32
    return %c0_i32, %c0_i32_0 : i32, i32
  }
}

</mosaic_0001>

<bundles_post_ra>
// kernel: tpu_custom_call.1
= control target key start
LH: loop header
LB: loop body
LE: loop exit
PB: predicated region body
PF: predicated region fallthrough
CT: control target
= control target key end

     0   :  { %10 = vsyncpa [#allocation3], 0  ;;  %s1487_s15 = smov 0   ;;  %s2021_s0 = inlined_call_operand.vmem [shape: bf16[512,36], index: 0, kind: input, shape index: {}]   ;;  %s2022_s1 = inlined_call_operand.vmem [shape: bf16[36,8], index: 1, kind: input, shape index: {}]   ;;  %s2023_s2 = inlined_call_operand.vmem [shape: f32[1,8], index: 2, kind: input, shape index: {}]   ;;  %s2024_s3 = inlined_call_operand.vmem [shape: bf16[512,8], index: 3, kind: output, shape index: {0}]   ;;  %s2025_s4 = inlined_call_operand.hbm [shape: f32[2,8], index: 4, kind: output, shape index: {1}]  }
   0x1 LB: > { %s1493_s16 = sadd.s32 4294967295, %s1457_s15   ;;  %p1177_p0 = scmp.ge.s32.totalorder %s1457_s15, 1  ;;  %s1457_s15 = sphi %s1487_s15, %s16_s15  }
   0x2   : > { %p162_p1 = scmp.lt.s32.totalorder %s1457_s15, 3 }
   0x4   : > { %p163_p2 = pnand %p1177_p0, %p162_p1 }
   0x5   : > { %v1402_v0 = vld [vmem:[%s2022_s1] sm:$0xff] (!%p163_p2)   ;;  %v1403_v1 = vld [vmem:[%s2022_s1 + $0x8] sm:$0xff] (!%p163_p2)   ;;  %s1178_s21 = sshll.u32 (!%p163_p2), %s1493_s16, 5  ;;  %v1404_v2 = vld [vmem:[%s2022_s1 + $0x10] ss:$0 sps:$4 sm:$0x33] (!%p163_p2)   ;;  %v716_v20 = vlaneseq (!%p163_p2) }
   0x6   : > { %166 = sbr.rel (%p163_p2) target bundleno = 343 (0x157), region = 32  ;;  %1339 = vmatprep.subr.bf16.mxu0 (!%p163_p2), %v1402_v0  ;;  %p189_p3 = scmp.lt.s32.totalorder (!%p163_p2), %s1178_s21, 63  ;;  %1377 = vmatprep.subr.bf16.mxu1 (!%p163_p2), %v1402_v0  ;;  %vm389_vm0 = vcmask (!%p163_p2), 1041408   ;;  %vm340_vm1 = vcmask (!%p163_p2), 293888   ;;  %v1459_v44 = vmov (!%p163_p2), 0.0  }
   0x7   : > { %1340 = vmatpush3.bf16.msra.mxu0 (!%p163_p2), %v1402_v0  ;;  %1380 = vmatpush3.bf16.msra.mxu1 (!%p163_p2), %v1402_v0  ;;  %v391_v3 = vsel (!%p163_p2), %vm389_vm0, %v1404_v2, 0  ;;  %v1549_v21 = vshrl.u32 (!%p163_p2), %v716_v20, 7  ;;  %s1250_s28 = sshll.u32 (!%p163_p2), %s1493_s16, 8  ;;  %p1283_p4 = scmp.ne.s32.totalorder (!%p163_p2), %s1493_s16, 0 }
   0x8   : > { %1341 = vmatprep.subr.bf16.mxu0 (!%p163_p2), %v1403_v1  ;;  %1378 = vmatprep.subr.bf16.mxu1 (!%p163_p2), %v1403_v1  ;;  %v1553_v23 = vstv (!%p163_p2), %s1250_s28 }
   0x9   : > { %v719_v22 = vadd.s32 (!%p163_p2), 16, %v1549_v21  ;;  %v720_v24 = vadd.s32 (!%p163_p2), 24, %v1549_v21  ;;  %v718_v26 = vadd.s32 (!%p163_p2), 8, %v1549_v21  ;;  %v723_v27 = vadd.s32 (!%p163_p2), 48, %v1549_v21 }
   0xa   : > { %v721_v28 = vadd.s32 (!%p163_p2), 32, %v1549_v21  ;;  %v724_v29 = vadd.s32 (!%p163_p2), 56, %v1549_v21  ;;  %v722_v30 = vadd.s32 (!%p163_p2), 40, %v1549_v21  ;;  %v750_v31 = vadd.s32 (!%p163_p2), %v1553_v23, %v1549_v21 }
   0xb   : > { %1342 = vmatpush3.bf16.msra.mxu0 (!%p163_p2), %v1403_v1  ;;  %1381 = vmatpush3.bf16.msra.mxu1 (!%p163_p2), %v1403_v1  ;;  %v752_v25 = vadd.s32 (!%p163_p2), %v1553_v23, %v719_v22  ;;  %v753_v32 = vadd.s32 (!%p163_p2), %v1553_v23, %v720_v24  ;;  %v727_v33 = vadd.s32 (!%p163_p2), 80, %v1549_v21  ;;  %v725_v34 = vadd.s32 (!%p163_p2), 64, %v1549_v21 }
   0xc   : > { %1383 = vmatprep.subr.msk.bf16.mxu0 (!%p163_p2), %vm389_vm0, %v1404_v2  ;;  %1384 = vmatprep.subr.msk.bf16.mxu1 (!%p163_p2), %vm389_vm0, %v1404_v2  ;;  %v751_v35 = vadd.s32 (!%p163_p2), %v1553_v23, %v718_v26  ;;  %v728_v36 = vadd.s32 (!%p163_p2), 88, %v1549_v21  ;;  %v756_v37 = vadd.s32 (!%p163_p2), %v1553_v23, %v723_v27  ;;  %v754_v38 = vadd.s32 (!%p163_p2), %v1553_v23, %v721_v28 }
   0xd   : > { %s2027_s21 = smov (!%p189_p3, %s1178_s21), 63  ;;  %vm784_vm2 = vcmp.lt.s32.totalorder %v752_v25, 512  ;;  %v726_v39 = vadd.s32 72, %v1549_v21  ;;  %v757_v40 = vadd.s32 %v1553_v23, %v724_v29  ;;  %v755_v41 = vadd.s32 %v1553_v23, %v722_v30 }
   0xe   : > { %s1179_s24 = sshll.u32 %s2027_s21, 2  ;;  %vm782_vm3 = vcmp.lt.s32.totalorder %v750_v31, 512  ;;  %vm785_vm4 = vcmp.lt.s32.totalorder %v753_v32, 512  ;;  %v760_v42 = vadd.s32 %v1553_v23, %v727_v33  ;;  %v758_v43 = vadd.s32 %v1553_v23, %v725_v34  ;;  %v1661_v32 = vld [vmem:[%s2023_s2] ss:$0 sm:$0xff] }
   0xf   : > { %s1515_s27 = scalar_lea.vmem %s2021_s0, %s1179_s24  ;;  %1344 = vmatpush3.bf16.msra.mxu0 %v391_v3  ;;  %1382 = vmatpush3.bf16.msra.mxu1 %v391_v3  ;;  %v1577_v45 = vsel %vm784_vm2, 1.0, %v1459_v44  ;;  %vm783_vm5 = vcmp.lt.s32.totalorder %v751_v35, 512  ;;  %v761_v46 = vadd.s32 %v1553_v23, %v728_v36  ;;  %vm788_vm6 = vcmp.lt.s32.totalorder %v756_v37, 512  ;;  %s1694_s7 = scalar_lea.vmem %s2024_s3, %s1179_s24 }
  0x10   : > { %v1405_v4 = vld [vmem:[%s1515_s27] sm:$0xff]   ;;  %v1406_v5 = vld [vmem:[%s1515_s27 + $0x8] sm:$0xff]   ;;  %v1407_v6 = vld [vmem:[%s1515_s27 + $0x10] sm:$0xff]   ;;  %vm786_vm7 = vcmp.lt.s32.totalorder %v754_v38, 512  ;;  %v759_v47 = vadd.s32 %v1553_v23, %v726_v39  ;;  %v731_v48 = vadd.s32 112, %v1549_v21  ;;  %v1583_v49 = vsel %vm782_vm3, 1.0, %v1459_v44 }
  0x11   : > { %1345 = vmatprep.mubr.msk.bf16.mxu0 %vm340_vm1, %v1405_v4  ;;  %v1408_v7 = vld [vmem:[%s1515_s27 + $0x18] sm:$0xff]   ;;  %v1413_v8 = vld [vmem:[%s1515_s27 + $0x40] sm:$0xff]   ;;  %v1414_v9 = vld [vmem:[%s1515_s27 + $0x48] sm:$0xff]   ;;  %v1586_v50 = vsel %vm785_vm4, 1.0, %v1459_v44  ;;  %vm789_vm8 = vcmp.lt.s32.totalorder %v757_v40, 512  ;;  %vm787_vm9 = vcmp.lt.s32.totalorder %v755_v41, 512 }
  0x12   : > { %1346 = vmatmul.mubr.msk.bf16.vlgmr.msra.gmra.mrb[0].mxu0 %vm340_vm1, %v1406_v5  ;;  %1361 = vmatprep.mubr.msk.bf16.mxu1 %vm340_vm1, %v1413_v8  ;;  %v1415_v10 = vld [vmem:[%s1515_s27 + $0x50] sm:$0xff]   ;;  %v1409_v11 = vld [vmem:[%s1515_s27 + $0x20] sm:$0xff]   ;;  %v1416_v12 = vld [vmem:[%s1515_s27 + $0x58] sm:$0xff]   ;;  %vm792_vm10 = vcmp.lt.s32.totalorder %v760_v42, 512  ;;  %vm790_vm11 = vcmp.lt.s32.totalorder %v758_v43, 512  ;;  %v729_v51 = vadd.s32 96, %v1549_v21  ;;  %v764_v57 = vadd.s32 %v1553_v23, %v731_v48 }
  0x13   : > { %1349 = vmatprep.mubr.msk.bf16.mxu0 %vm340_vm1, %v1407_v6  ;;  %1362 = vmatmul.mubr.msk.bf16.vlgmr.msra.gmra.mrb[0].mxu1 %vm340_vm1, %v1414_v9  ;;  %v1417_v13 = vld [vmem:[%s1515_s27 + $0x60] sm:$0xff]   ;;  %v1410_v14 = vld [vmem:[%s1515_s27 + $0x28] sm:$0xff]   ;;  %v1411_v15 = vld [vmem:[%s1515_s27 + $0x30] sm:$0xff]   ;;  %v732_v52 = vadd.s32 120, %v1549_v21  ;;  %v1591_v53 = vsel %vm783_vm5, 1.0, %v1459_v44  ;;  %v1594_v54 = vsel %vm788_vm6, 1.0, %v1459_v44 }
  0x14   : > { %1365 = vmatprep.mubr.msk.bf16.mxu1 %vm340_vm1, %v1415_v10  ;;  %v1418_v16 = vld [vmem:[%s1515_s27 + $0x68] sm:$0xff]   ;;  %v1419_v17 = vld [vmem:[%s1515_s27 + $0x70] sm:$0xff]   ;;  %v1412_v18 = vld [vmem:[%s1515_s27 + $0x38] sm:$0xff]   ;;  %v1597_v55 = vsel %vm786_vm7, 1.0, %v1459_v44  ;;  %vm793_vm12 = vcmp.lt.s32.totalorder %v761_v46, 512  ;;  %v1600_v56 = vsel %vm789_vm8, 1.0, %v1459_v44  ;;  %v762_v0 = vadd.s32 %v1553_v23, %v729_v51 }
  0x15   : > { %v1420_v19 = vld [vmem:[%s1515_s27 + $0x78] sm:$0xff]   ;;  %vm791_vm13 = vcmp.lt.s32.totalorder %v759_v47, 512  ;;  %v730_v58 = vadd.s32 104, %v1549_v21  ;;  %v1605_v59 = vsel %vm787_vm9, 1.0, %v1459_v44  ;;  %v1608_v60 = vsel %vm792_vm10, 1.0, %v1459_v44 }
  0x16   : > { %v1611_v61 = vsel %vm790_vm11, 1.0, %v1459_v44  ;;  %v735_v62 = vadd.s32 144, %v1549_v21  ;;  %v1615_v63 = vsel %vm793_vm12, 1.0, %v1459_v44  ;;  %v765_v1 = vadd.s32 %v1553_v23, %v732_v52 }
  0x17   : > { %v733_v2 = vadd.s32 128, %v1549_v21  ;;  %v1621_v3 = vsel %vm791_vm13, 1.0, %v1459_v44  ;;  %v736_v4 = vadd.s32 152, %v1549_v21  ;;  %v734_v5 = vadd.s32 136, %v1549_v21 }
  0x18   : > { %v739_v6 = vadd.s32 176, %v1549_v21  ;;  %vm796_vm14 = vcmp.lt.s32.totalorder %v764_v57, 512  ;;  %v737_v8 = vadd.s32 160, %v1549_v21  ;;  %v740_v9 = vadd.s32 184, %v1549_v21 }
  0x19   : > { %v768_v10 = vadd.s32 %v1553_v23, %v735_v62  ;;  %vm794_vm15 = vcmp.lt.s32.totalorder %v762_v0, 512  ;;  %vm797_vm0 = vcmp.lt.s32.totalorder %v765_v1, 512  ;;  %v1641_v20 = vsel %vm796_vm14, 1.0, %v1459_v44 }
  0x1a   : > { %1350 = vmatmul.mubr.msk.bf16.gmra.mrb[4].mxu0 %vm340_vm1, %v1408_v7  ;;  %v763_v7 = vadd.s32 %v1553_v23, %v730_v58  ;;  %v770_v22 = vadd.s32 %v1553_v23, %v737_v8  ;;  %v773_v24 = vadd.s32 %v1553_v23, %v740_v9  ;;  %vm910_vm4 = vcmask 64512  }
  0x1b   : > { %1353 = vmatprep.mubr.msk.bf16.mxu0 %vm340_vm1, %v1409_v11  ;;  %1366 = vmatmul.mubr.msk.bf16.gmra.mrb[4].mxu1 %vm340_vm1, %v1416_v12  ;;  %v738_v11 = vadd.s32 168, %v1549_v21  ;;  %v743_v12 = vadd.s32 208, %v1549_v21  ;;  %vm800_vm3 = vcmp.lt.s32.totalorder %v768_v10, 512  ;;  %v1650_v28 = vsel %vm794_vm15, 1.0, %v1459_v44 }
  0x1c   : > { %1369 = vmatprep.mubr.msk.bf16.mxu1 %vm340_vm1, %v1417_v13  ;;  %v741_v13 = vadd.s32 192, %v1549_v21  ;;  %vm795_vm2 = vcmp.lt.s32.totalorder %v763_v7, 512  ;;  %v1654_v29 = vsel %vm797_vm0, 1.0, %v1459_v44  ;;  %v1668_v34 = vsel %vm800_vm3, 1.0, %v1459_v44 }
  0x1d   : > { %v771_v25 = vadd.s32 %v1553_v23, %v738_v11  ;;  %v776_v26 = vadd.s32 %v1553_v23, %v743_v12  ;;  %v1665_v33 = vsel %vm795_vm2, 1.0, %v1459_v44  ;;  %vm802_vm9 = vcmp.lt.s32.totalorder %v770_v22, 512 }
  0x1e   : > { %v774_v27 = vadd.s32 %v1553_v23, %v741_v13  ;;  %vm805_vm10 = vcmp.lt.s32.totalorder %v773_v24, 512  ;;  %v1684_v42 = vsel %vm802_vm9, 1.0, %v1459_v44  ;;  %v1724_v10 = vadd.s32 240, %v1549_v21 }
  0x1f   : > { %vm803_vm11 = vcmp.lt.s32.totalorder %v771_v25, 512  ;;  %vm808_vm12 = vcmp.lt.s32.totalorder %v776_v26, 512  ;;  %v1687_v43 = vsel %vm805_vm10, 1.0, %v1459_v44 }
  0x20   : > { %vm806_vm13 = vcmp.lt.s32.totalorder %v774_v27, 512  ;;  %v1699_v48 = vsel %vm803_vm11, 1.0, %v1459_v44  ;;  %v1703_v51 = vsel %vm808_vm12, 1.0, %v1459_v44 }
  0x21   : > { %v1707_v52 = vsel %vm806_vm13, 1.0, %v1459_v44 }
  0x22   : > { %1354 = vmatmul.mubr.msk.bf16.gmra.mrb[8].mxu0 %vm340_vm1, %v1410_v14  ;;  %v766_v14 = vadd.s32 %v1553_v23, %v733_v2 }
  0x23   : > { %1357 = vmatprep.mubr.msk.bf16.mxu0 %vm340_vm1, %v1411_v15  ;;  %1370 = vmatmul.mubr.msk.bf16.gmra.mrb[8].mxu1 %vm340_vm1, %v1418_v16  ;;  %v744_v15 = vadd.s32 216, %v1549_v21  ;;  %v769_v16 = vadd.s32 %v1553_v23, %v736_v4 }
  0x24   : > { %1373 = vmatprep.mubr.msk.bf16.mxu1 %vm340_vm1, %v1419_v17  ;;  %v767_v17 = vadd.s32 %v1553_v23, %v734_v5  ;;  %vm798_vm5 = vcmp.lt.s32.totalorder %v766_v14, 512  ;;  %v745_v14 = vadd.s32 224, %v1549_v21 }
  0x25   : > { %v777_v30 = vadd.s32 %v1553_v23, %v744_v15  ;;  %vm801_vm6 = vcmp.lt.s32.totalorder %v769_v16, 512  ;;  %v1671_v35 = vsel %vm798_vm5, 1.0, %v1459_v44 }
  0x26   : > { %vm799_vm7 = vcmp.lt.s32.totalorder %v767_v17, 512  ;;  %v1674_v37 = vsel %vm801_vm6, 1.0, %v1459_v44  ;;  %vm1087_vm6 = vcmask (!%p1283_p4), 58368  }
  0x27   : > { %v1677_v38 = vsel %vm799_vm7, 1.0, %v1459_v44  ;;  %vm809_vm14 = vcmp.lt.s32.totalorder %v777_v30, 512 }
  0x28   : > { %v1713_v1 = vsel %vm809_vm14, 1.0, %v1459_v44 }
  0x2a   : > { %1358 = vmatmul.mubr.msk.bf16.gmra.mrb[12].mxu0 %vm340_vm1, %v1412_v18  ;;  %v772_v18 = vadd.s32 %v1553_v23, %v739_v6 }
  0x2b   : > { %1374 = vmatmul.mubr.msk.bf16.gmra.mrb[12].mxu1 %vm340_vm1, %v1420_v19  ;;  %v742_v19 = vadd.s32 200, %v1549_v21  ;;  %vm682_vm1 = vcmask 60416  }
  0x2c   : > { %vm804_vm8 = vcmp.lt.s32.totalorder %v772_v18, 512  ;;  %v748_v18 = vadd.s32 248, %v1549_v21 }
  0x2d   : > { %v775_v31 = vadd.s32 %v1553_v23, %v742_v19  ;;  %v1680_v39 = vsel %vm804_vm8, 1.0, %v1459_v44 }
  0x2f   : > { %vm807_vm15 = vcmp.lt.s32.totalorder %v775_v31, 512 }
  0x30   : > { %v1718_v6 = vsel %vm807_vm15, 1.0, %v1459_v44 }
  0xe5   : > { %v1347_v36 = vpop.f32.mrb[0].mxu0 }
  0xe6   : > { %v436_v40 = vadd.f32 %v1347_v36, %v1661_v32  ;;  %v427_v41 = vpop.f32.mrb[1].mxu0  ;;  %v1363_v9 = vpop.f32.mrb[0].mxu1 }
  0xe7   : > { %v428_v46 = vadd.f32 %v1661_v32, %v427_v41  ;;  %v1348_v47 = vpop.f32.mrb[2].mxu0  ;;  %v491_v13 = vpop.f32.mrb[1].mxu1 }
  0xe8   : > { %v1290_v57 = vpack.c.bf16 %v436_v40, %v436_v40  ;;  %v880_v58 = vmul.f32 %v1577_v45, %v436_v40  ;;  %v439_v62 = vadd.f32 %v1348_v47, %v1661_v32  ;;  %v430_v0 = vpop.f32.mrb[3].mxu0  ;;  %v1737_v17 = vpop.f32.mrb[2].mxu1  ;;  %v1745_v25 = vadd.f32 %v1661_v32, %v491_v13 }
  0xe9   : > { %v1288_v2 = vpack.c.bf16 %v428_v46, %v428_v46  ;;  %v878_v4 = vmul.f32 %v1583_v49, %v428_v46  ;;  %v431_v5 = vadd.f32 %v1661_v32, %v430_v0  ;;  %v1747_v26 = vpop.f32.mrb[3].mxu1 }
  0xea   : > { %685 = vst.msk [vmem:[%s1694_s7 + $0x8] sm:$0xf] %vm682_vm1, %v1290_v57  ;;  %v982_v7 = vmul.f32 %v880_v58, %v436_v40  ;;  %v1291_v45 = vpack.c.bf16 %v439_v62, %v439_v62  ;;  %v881_v8 = vmul.f32 %v1586_v50, %v439_v62  ;;  %v914_v15 = vsel %vm910_vm4, %v880_v58, 0.0 }
  0xeb   : > { %683 = vst.msk [vmem:[%s1694_s7] sm:$0xf] %vm682_vm1, %v1288_v2  ;;  %v980_v49 = vmul.f32 %v878_v4, %v428_v46  ;;  %v1289_v11 = vpack.c.bf16 %v431_v5, %v431_v5  ;;  %v879_v12 = vmul.f32 %v1591_v53, %v431_v5  ;;  %v911_v16 = vsel %vm910_vm4, %v878_v4, 0.0 }
  0xec   : > { %686 = vst.msk [vmem:[%s1694_s7 + $0xc] sm:$0xf] %vm682_vm1, %v1291_v45  ;;  %v1735_v50 = vadd.f32 %v1363_v9, %v1661_v32  ;;  %v1015_v19 = vsel %vm910_vm4, %v982_v7, 0.0  ;;  %v983_v27 = vmul.f32 %v881_v8, %v439_v62  ;;  %v1304_v58 = vpack.c.bf16 %v1745_v25, %v1745_v25 }
  0xed   : > { %684 = vst.msk [vmem:[%s1694_s7 + $0x4] sm:$0xf] %vm682_vm1, %v1289_v11  ;;  %v912_v53 = vsel %vm910_vm4, %v879_v12, 0.0  ;;  %v981_v22 = vmul.f32 %v879_v12, %v431_v5  ;;  %v1351_v24 = vpop.f32.mrb[4].mxu0  ;;  %v1012_v41 = vsel %vm910_vm4, %v980_v49, 0.0  ;;  %v916_v62 = vsel %vm910_vm4, %v881_v8, 0.0 }
  0xee   : > { %v913_v30 = vadd.f32 %v912_v53, %v911_v16  ;;  %v452_v31 = vadd.f32 %v1351_v24, %v1661_v32  ;;  %v443_v36 = vpop.f32.mrb[5].mxu0  ;;  %v1306_v40 = vpack.c.bf16 %v1735_v50, %v1735_v50  ;;  %699 = vst.msk [vmem:[%s1694_s7 + $0x40] sm:$0xf] %vm682_vm1, %v1304_v58  ;;  %v1768_v13 = vpop.f32.mrb[4].mxu1  ;;  %v1017_v16 = vsel %vm910_vm4, %v983_v27, 0.0 }
  0xef   : > { %v1013_v46 = vsel %vm910_vm4, %v981_v22, 0.0  ;;  %v444_v47 = vadd.f32 %v1661_v32, %v443_v36  ;;  %v1352_v57 = vpop.f32.mrb[6].mxu0 }
  0xf0   : > { %v915_v0 = vadd.f32 %v914_v15, %v913_v30  ;;  %v1014_v2 = vadd.f32 %v1013_v46, %v1012_v41  ;;  %v1294_v4 = vpack.c.bf16 %v452_v31, %v452_v31  ;;  %v446_v5 = vpop.f32.mrb[7].mxu0  ;;  %701 = vst.msk [vmem:[%s1694_s7 + $0x48] sm:$0xf] %vm682_vm1, %v1306_v40  ;;  %v455_v9 = vadd.f32 %v1352_v57, %v1661_v32 }
  0xf1   : > { %v1292_v7 = vpack.c.bf16 %v444_v47, %v444_v47  ;;  %v882_v45 = vmul.f32 %v1597_v55, %v444_v47  ;;  %v447_v49 = vadd.f32 %v1661_v32, %v446_v5  ;;  %v884_v8 = vmul.f32 %v1594_v54, %v452_v31 }
  0xf2   : > { %v1016_v11 = vadd.f32 %v1015_v19, %v1014_v2  ;;  %689 = vst.msk [vmem:[%s1694_s7 + $0x18] sm:$0xf] %vm682_vm1, %v1294_v4  ;;  %v917_v12 = vadd.f32 %v916_v62, %v915_v0  ;;  %v746_v15 = vadd.s32 232, %v1549_v21  ;;  %v1295_v22 = vpack.c.bf16 %v455_v9, %v455_v9  ;;  %v1775_v19 = vpop.f32.mrb[5].mxu1 }
  0xf3   : > { %687 = vst.msk [vmem:[%s1694_s7 + $0x10] sm:$0xf] %vm682_vm1, %v1292_v7  ;;  %v918_v55 = vsel %vm910_vm4, %v882_v45, 0.0  ;;  %v984_v53 = vmul.f32 %v882_v45, %v444_v47  ;;  %v885_v54 = vmul.f32 %v1600_v56, %v455_v9  ;;  %v1293_v36 = vpack.c.bf16 %v447_v49, %v447_v49  ;;  %v1778_v40 = vpop.f32.mrb[6].mxu1 }
  0xf4   : > { %v919_v24 = vadd.f32 %v918_v55, %v917_v12  ;;  %v1018_v30 = vadd.f32 %v1017_v16, %v1016_v11  ;;  %690 = vst.msk [vmem:[%s1694_s7 + $0x1c] sm:$0xf] %vm682_vm1, %v1295_v22  ;;  %v883_v27 = vmul.f32 %v1605_v59, %v447_v49  ;;  %v1784_v46 = vpop.f32.mrb[7].mxu1  ;;  %v1788_v47 = vadd.s32 %v1553_v23, %v1724_v10 }
  0xf5   : > { %v1019_v21 = vsel %vm910_vm4, %v984_v53, 0.0  ;;  %v1355_v41 = vpop.f32.mrb[8].mxu0  ;;  %v1791_v57 = vadd.s32 %v1553_v23, %v745_v14  ;;  %v986_v56 = vmul.f32 %v884_v8, %v452_v31  ;;  %688 = vst.msk [vmem:[%s1694_s7 + $0x14] sm:$0xf] %vm682_vm1, %v1293_v36  ;;  %v1797_v2 = vadd.s32 %v1553_v23, %v748_v18 }
  0xf6   : > { %v1020_v58 = vadd.f32 %v1019_v21, %v1018_v30  ;;  %v468_v62 = vadd.f32 %v1355_v41, %v1661_v32  ;;  %v459_v0 = vpop.f32.mrb[9].mxu0  ;;  %v922_v59 = vsel %vm910_vm4, %v884_v8, 0.0  ;;  %v920_v4 = vsel %vm910_vm4, %v883_v27, 0.0 }
  0xf7   : > { %v985_v10 = vmul.f32 %v883_v27, %v447_v49  ;;  %v460_v5 = vadd.f32 %v1661_v32, %v459_v0  ;;  %v1356_v14 = vpop.f32.mrb[10].mxu0  ;;  %v987_v7 = vmul.f32 %v885_v54, %v455_v9  ;;  %v921_v31 = vadd.f32 %v920_v4, %v919_v24  ;;  %v1810_v24 = vpop.f32.mrb[8].mxu1 }
  0xf8   : > { %v1298_v45 = vpack.c.bf16 %v468_v62, %v468_v62  ;;  %v471_v11 = vadd.f32 %v1356_v14, %v1661_v32  ;;  %v462_v12 = vpop.f32.mrb[11].mxu0  ;;  %v1023_v53 = vsel %vm910_vm4, %v986_v56, 0.0  ;;  %v888_v9 = vmul.f32 %v1608_v60, %v468_v62  ;;  %v1816_v27 = vpop.f32.mrb[9].mxu1 }
  0xf9   : > { %v1021_v16 = vsel %vm910_vm4, %v985_v10, 0.0  ;;  %v1296_v18 = vpack.c.bf16 %v460_v5, %v460_v5  ;;  %v886_v55 = vmul.f32 %v1611_v61, %v460_v5  ;;  %v463_v8 = vadd.f32 %v1661_v32, %v462_v12 }
  0xfa   : > { %v923_v49 = vadd.f32 %v922_v59, %v921_v31  ;;  %v1022_v22 = vadd.f32 %v1021_v16, %v1020_v58  ;;  %693 = vst.msk [vmem:[%s1694_s7 + $0x28] sm:$0xf] %vm682_vm1, %v1298_v45  ;;  %v924_v30 = vsel %vm910_vm4, %v885_v54, 0.0  ;;  %v1299_v21 = vpack.c.bf16 %v471_v11, %v471_v11  ;;  %v1819_v59 = vpop.f32.mrb[10].mxu1 }
  0xfb   : > { %691 = vst.msk [vmem:[%s1694_s7 + $0x20] sm:$0xf] %vm682_vm1, %v1296_v18  ;;  %v926_v36 = vsel %vm910_vm4, %v886_v55, 0.0  ;;  %v988_v61 = vmul.f32 %v886_v55, %v460_v5  ;;  %v889_v58 = vmul.f32 %v1615_v63, %v471_v11  ;;  %v1297_v0 = vpack.c.bf16 %v463_v8, %v463_v8  ;;  %v1826_v5 = vpop.f32.mrb[11].mxu1 }
  0xfc   : > { %v1024_v41 = vadd.f32 %v1023_v53, %v1022_v22  ;;  %v925_v56 = vadd.f32 %v924_v30, %v923_v49  ;;  %v1025_v60 = vsel %vm910_vm4, %v987_v7, 0.0  ;;  %694 = vst.msk [vmem:[%s1694_s7 + $0x2c] sm:$0xf] %vm682_vm1, %v1299_v21  ;;  %v887_v4 = vmul.f32 %v1621_v3, %v463_v8 }
  0xfd   : > { %v1027_v54 = vsel %vm910_vm4, %v988_v61, 0.0  ;;  %v1359_v10 = vpop.f32.mrb[12].mxu0  ;;  %v1829_v14 = vadd.s32 %v1553_v23, %v746_v15  ;;  %v990_v31 = vmul.f32 %v888_v9, %v468_v62  ;;  %692 = vst.msk [vmem:[%s1694_s7 + $0x24] sm:$0xf] %vm682_vm1, %v1297_v0  ;;  %v930_v16 = vsel %vm910_vm4, %v888_v9, 0.0 }
  0xfe   : > { %v927_v45 = vadd.f32 %v926_v36, %v925_v56  ;;  %v1026_v63 = vadd.f32 %v1025_v60, %v1024_v41  ;;  %v484_v12 = vadd.f32 %v1359_v10, %v1661_v32  ;;  %v475_v7 = vpop.f32.mrb[13].mxu0  ;;  %v928_v18 = vsel %vm910_vm4, %v887_v4, 0.0 }
  0xff   : > { %v989_v55 = vmul.f32 %v887_v4, %v463_v8  ;;  %v476_v3 = vadd.f32 %v1661_v32, %v475_v7  ;;  %v1360_v53 = vpop.f32.mrb[14].mxu0  ;;  %v991_v23 = vmul.f32 %v889_v58, %v471_v11  ;;  %v1031_v21 = vsel %vm910_vm4, %v990_v31, 0.0  ;;  %v1844_v11 = vpop.f32.mrb[12].mxu1 }
 0x100   : > { %v1028_v49 = vadd.f32 %v1027_v54, %v1026_v63  ;;  %v929_v15 = vadd.f32 %v928_v18, %v927_v45  ;;  %v1302_v62 = vpack.c.bf16 %v484_v12, %v484_v12  ;;  %v478_v22 = vpop.f32.mrb[15].mxu0  ;;  %v487_v9 = vadd.f32 %v1360_v53, %v1661_v32  ;;  %v1850_v4 = vpop.f32.mrb[13].mxu1 }
 0x101   : > { %v1029_v30 = vsel %vm910_vm4, %v989_v55, 0.0  ;;  %v1300_v36 = vpack.c.bf16 %v476_v3, %v476_v3  ;;  %v890_v61 = vmul.f32 %v1650_v28, %v476_v3  ;;  %v932_v8 = vsel %vm910_vm4, %v889_v58, 0.0  ;;  %v1854_v45 = vpop.f32.mrb[14].mxu1 }
 0x102   : > { %v931_v41 = vadd.f32 %v930_v16, %v929_v15  ;;  %v1030_v56 = vadd.f32 %v1029_v30, %v1028_v49  ;;  %697 = vst.msk [vmem:[%s1694_s7 + $0x38] sm:$0xf] %vm682_vm1, %v1302_v62  ;;  %v892_v0 = vmul.f32 %v1641_v20, %v484_v12  ;;  %v1303_v54 = vpack.c.bf16 %v487_v9, %v487_v9  ;;  %v1863_v18 = vpop.f32.mrb[15].mxu1 }
 0x103   : > { %695 = vst.msk [vmem:[%s1694_s7 + $0x30] sm:$0xf] %vm682_vm1, %v1300_v36  ;;  %v934_v60 = vsel %vm910_vm4, %v890_v61, 0.0  ;;  %v992_v28 = vmul.f32 %v890_v61, %v476_v3  ;;  %v479_v58 = vadd.f32 %v1661_v32, %v478_v22  ;;  %vm812_vm0 = vcmp.lt.s32.totalorder %v1788_v47, 512 }
 0x104   : > { %v1032_v10 = vadd.f32 %v1031_v21, %v1030_v56  ;;  %v933_v31 = vadd.f32 %v932_v8, %v931_v41  ;;  %v1033_v63 = vsel %vm910_vm4, %v991_v23, 0.0  ;;  %698 = vst.msk [vmem:[%s1694_s7 + $0x3c] sm:$0xf] %vm682_vm1, %v1303_v54  ;;  %v893_v7 = vmul.f32 %v1654_v29, %v487_v9 }
 0x105   : > { %v1035_v20 = vsel %vm910_vm4, %v992_v28, 0.0  ;;  %v894_v16 = vmul.f32 %v1671_v35, %v1745_v25  ;;  %v1301_v53 = vpack.c.bf16 %v479_v58, %v479_v58  ;;  %v891_v49 = vmul.f32 %v1665_v33, %v479_v58 }
 0x106   : > { %v935_v55 = vadd.f32 %v934_v60, %v933_v31  ;;  %v1034_v3 = vadd.f32 %v1033_v63, %v1032_v10  ;;  %v938_v15 = vsel %vm910_vm4, %v892_v0, 0.0  ;;  %v994_v62 = vmul.f32 %v892_v0, %v484_v12 }
 0x107   : > { %v896_v23 = vmul.f32 %v1668_v34, %v1735_v50  ;;  %v503_v22 = vadd.f32 %v1737_v17, %v1661_v32  ;;  %696 = vst.msk [vmem:[%s1694_s7 + $0x34] sm:$0xf] %vm682_vm1, %v1301_v53  ;;  %v936_v35 = vsel %vm910_vm4, %v891_v49, 0.0  ;;  %v993_v30 = vmul.f32 %v891_v49, %v479_v58 }
 0x108   : > { %v1036_v29 = vadd.f32 %v1035_v20, %v1034_v3  ;;  %v495_v36 = vadd.f32 %v1661_v32, %v1747_v26  ;;  %v995_v33 = vmul.f32 %v893_v7, %v487_v9  ;;  %v937_v61 = vadd.f32 %v936_v35, %v935_v55 }
 0x109   : > { %v996_v12 = vmul.f32 %v894_v16, %v1745_v25  ;;  %v1307_v21 = vpack.c.bf16 %v503_v22, %v503_v22  ;;  %v1037_v34 = vsel %vm910_vm4, %v993_v30, 0.0  ;;  %v516_v41 = vadd.f32 %v1768_v13, %v1661_v32 }
 0x10a   : > { %v1305_v8 = vpack.c.bf16 %v495_v36, %v495_v36  ;;  %v895_v17 = vmul.f32 %v1677_v38, %v495_v36  ;;  %v939_v56 = vadd.f32 %v938_v15, %v937_v61  ;;  %v1038_v0 = vadd.f32 %v1037_v34, %v1036_v29 }
 0x10b   : > { %v998_v60 = vmul.f32 %v896_v23, %v1735_v50  ;;  %702 = vst.msk [vmem:[%s1694_s7 + $0x4c] sm:$0xf] %vm682_vm1, %v1307_v21  ;;  %v1887_v25 = vsel %vm812_vm0, 1.0, %v1459_v44  ;;  %v1039_v26 = vsel %vm910_vm4, %v994_v62, 0.0  ;;  %v940_v9 = vsel %vm910_vm4, %v893_v7, 0.0 }
 0x10c   : > { %v942_v38 = vsel %vm910_vm4, %v894_v16, 0.0  ;;  %700 = vst.msk [vmem:[%s1694_s7 + $0x44] sm:$0xf] %vm682_vm1, %v1305_v8  ;;  %v1310_v13 = vpack.c.bf16 %v516_v41, %v516_v41  ;;  %v1040_v28 = vadd.f32 %v1039_v26, %v1038_v0  ;;  %v941_v54 = vadd.f32 %v940_v9, %v939_v56 }
 0x10d   : > { %v897_v50 = vmul.f32 %v1674_v37, %v503_v22  ;;  %v508_v10 = vadd.f32 %v1661_v32, %v1775_v19  ;;  %v1041_v47 = vsel %vm910_vm4, %v995_v33, 0.0  ;;  %v1043_v31 = vsel %vm910_vm4, %v996_v12, 0.0 }
 0x10e   : > { %v997_v58 = vmul.f32 %v895_v17, %v495_v36  ;;  %705 = vst.msk [vmem:[%s1694_s7 + $0x58] sm:$0xf] %vm682_vm1, %v1310_v13  ;;  %v519_v63 = vadd.f32 %v1778_v40, %v1661_v32  ;;  %v943_v20 = vadd.f32 %v942_v38, %v941_v54  ;;  %v1042_v7 = vadd.f32 %v1041_v47, %v1040_v28 }
 0x10f   : > { %v900_v16 = vmul.f32 %v1680_v39, %v516_v41  ;;  %v1308_v37 = vpack.c.bf16 %v508_v10, %v508_v10  ;;  %v944_v55 = vsel %vm910_vm4, %v895_v17, 0.0  ;;  %v898_v19 = vmul.f32 %v1684_v42, %v508_v10 }
 0x110   : > { %v1311_v3 = vpack.c.bf16 %v519_v63, %v519_v63  ;;  %v511_v53 = vadd.f32 %v1661_v32, %v1784_v46  ;;  %v946_v49 = vsel %vm910_vm4, %v896_v23, 0.0  ;;  %v1044_v15 = vadd.f32 %v1043_v31, %v1042_v7 }
 0x111   : > { %v999_v62 = vmul.f32 %v897_v50, %v503_v22  ;;  %v945_v29 = vadd.f32 %v944_v55, %v943_v20  ;;  %703 = vst.msk [vmem:[%s1694_s7 + $0x50] sm:$0xf] %vm682_vm1, %v1308_v37  ;;  %v1047_v40 = vsel %vm910_vm4, %v998_v60, 0.0  ;;  %v1045_v39 = vsel %vm910_vm4, %v997_v58, 0.0 }
 0x112   : > { %706 = vst.msk [vmem:[%s1694_s7 + $0x5c] sm:$0xf] %vm682_vm1, %v1311_v3  ;;  %v1309_v35 = vpack.c.bf16 %v511_v53, %v511_v53  ;;  %v899_v42 = vmul.f32 %v1699_v48, %v511_v53  ;;  %vm810_vm2 = vcmp.lt.s32.totalorder %v1791_v57, 512  ;;  %vm811_vm3 = vcmp.lt.s32.totalorder %v1829_v14, 512 }
 0x113   : > { %v947_v46 = vadd.f32 %v946_v49, %v945_v29  ;;  %v1046_v23 = vadd.f32 %v1045_v39, %v1044_v15  ;;  %v1002_v22 = vmul.f32 %v900_v16, %v516_v41  ;;  %v532_v30 = vadd.f32 %v1810_v24, %v1661_v32 }
 0x114   : > { %v948_v36 = vsel %vm910_vm4, %v897_v50, 0.0  ;;  %v950_v33 = vsel %vm910_vm4, %v898_v19, 0.0  ;;  %v1000_v61 = vmul.f32 %v898_v19, %v508_v10  ;;  %704 = vst.msk [vmem:[%s1694_s7 + $0x54] sm:$0xf] %vm682_vm1, %v1309_v35  ;;  %v524_v48 = vadd.f32 %v1661_v32, %v1816_v27 }
 0x115   : > { %v1049_v12 = vsel %vm910_vm4, %v999_v62, 0.0  ;;  %v1048_v21 = vadd.f32 %v1047_v40, %v1046_v23  ;;  %v949_v34 = vadd.f32 %v948_v36, %v947_v46  ;;  %v1314_v8 = vpack.c.bf16 %v532_v30, %v532_v30 }
 0x116   : > { %v901_v17 = vmul.f32 %v1687_v43, %v519_v63  ;;  %v1001_v24 = vmul.f32 %v899_v42, %v511_v53  ;;  %v1312_v41 = vpack.c.bf16 %v524_v48, %v524_v48  ;;  %v535_v56 = vadd.f32 %v1819_v59, %v1661_v32 }
 0x117   : > { %v954_v0 = vsel %vm910_vm4, %v900_v16, 0.0  ;;  %v1055_v60 = vsel %vm910_vm4, %v1002_v22, 0.0  ;;  %v951_v26 = vadd.f32 %v950_v33, %v949_v34  ;;  %v1050_v27 = vadd.f32 %v1049_v12, %v1048_v21  ;;  %709 = vst.msk [vmem:[%s1694_s7 + $0x68] sm:$0xf] %vm682_vm1, %v1314_v8 }
 0x118   : > { %v1051_v9 = vsel %vm910_vm4, %v1000_v61, 0.0  ;;  %v952_v38 = vsel %vm910_vm4, %v899_v42, 0.0  ;;  %707 = vst.msk [vmem:[%s1694_s7 + $0x60] sm:$0xf] %vm682_vm1, %v1312_v41  ;;  %v902_v43 = vmul.f32 %v1707_v52, %v524_v48  ;;  %v1315_v13 = vpack.c.bf16 %v535_v56, %v535_v56 }
 0x119   : > { %vm813_vm5 = vcmp.lt.s32.totalorder %v1797_v2, 512  ;;  %v1052_v59 = vadd.f32 %v1051_v9, %v1050_v27  ;;  %v956_v28 = vsel %vm910_vm4, %v901_v17, 0.0  ;;  %v953_v54 = vadd.f32 %v952_v38, %v951_v26 }
 0x11a   : > { %v527_v50 = vadd.f32 %v1661_v32, %v1826_v5  ;;  %v1003_v10 = vmul.f32 %v901_v17, %v519_v63  ;;  %v1053_v47 = vsel %vm910_vm4, %v1001_v24, 0.0  ;;  %v904_v31 = vmul.f32 %v1703_v51, %v532_v30  ;;  %710 = vst.msk [vmem:[%s1694_s7 + $0x6c] sm:$0xf] %vm682_vm1, %v1315_v13 }
 0x11b   : > { %v548_v52 = vadd.f32 %v1844_v11, %v1661_v32  ;;  %v955_v58 = vadd.f32 %v954_v0, %v953_v54  ;;  %v1054_v20 = vadd.f32 %v1053_v47, %v1052_v59  ;;  %v958_v37 = vsel %vm910_vm4, %v902_v43, 0.0 }
 0x11c   : > { %v1313_v7 = vpack.c.bf16 %v527_v50, %v527_v50  ;;  %v903_v16 = vmul.f32 %v1718_v6, %v527_v50  ;;  %v1004_v5 = vmul.f32 %v902_v43, %v524_v48  ;;  %v540_v63 = vadd.f32 %v1661_v32, %v1850_v4 }
 0x11d   : > { %v1318_v55 = vpack.c.bf16 %v548_v52, %v548_v52  ;;  %v1056_v19 = vadd.f32 %v1055_v60, %v1054_v20  ;;  %v957_v51 = vadd.f32 %v956_v28, %v955_v58  ;;  %v1279_v11 = vsel %vm810_vm2, 1.0, %v1459_v44 }
 0x11e   : > { %708 = vst.msk [vmem:[%s1694_s7 + $0x64] sm:$0xf] %vm682_vm1, %v1313_v7  ;;  %v1280_v6 = vsel %vm811_vm3, 1.0, %v1459_v44  ;;  %v1057_v3 = vsel %vm910_vm4, %v1003_v10, 0.0  ;;  %v905_v53 = vmul.f32 %v1713_v1, %v535_v56  ;;  %v1005_v49 = vmul.f32 %v903_v16, %v527_v50 }
 0x11f   : > { %713 = vst.msk [vmem:[%s1694_s7 + $0x78] sm:$0xf] %vm682_vm1, %v1318_v55  ;;  %v1316_v4 = vpack.c.bf16 %v540_v63, %v540_v63  ;;  %v1006_v15 = vmul.f32 %v904_v31, %v532_v30  ;;  %v959_v62 = vadd.f32 %v958_v37, %v957_v51  ;;  %v1058_v29 = vadd.f32 %v1057_v3, %v1056_v19 }
 0x120   : > { %v551_v40 = vadd.f32 %v1854_v45, %v1661_v32  ;;  %v1059_v57 = vsel %vm910_vm4, %v1004_v5, 0.0  ;;  %v960_v14 = vsel %vm910_vm4, %v903_v16, 0.0  ;;  %v906_v39 = vmul.f32 %v1279_v11, %v540_v63 }
 0x121   : > { %711 = vst.msk [vmem:[%s1694_s7 + $0x70] sm:$0xf] %vm682_vm1, %v1316_v4  ;;  %v543_v1 = vadd.f32 %v1661_v32, %v1863_v18  ;;  %v962_v35 = vsel %vm910_vm4, %v904_v31, 0.0  ;;  %v1060_v42 = vadd.f32 %v1059_v57, %v1058_v29  ;;  %v961_v46 = vadd.f32 %v960_v14, %v959_v62 }
 0x122   : > { %v1319_v23 = vpack.c.bf16 %v551_v40, %v551_v40  ;;  %v1007_v22 = vmul.f32 %v905_v53, %v535_v56  ;;  %v1061_v45 = vsel %vm910_vm4, %v1005_v49, 0.0  ;;  %v1063_v33 = vsel %vm910_vm4, %v1006_v15, 0.0 }
 0x123   : > { %v1317_v30 = vpack.c.bf16 %v543_v1, %v543_v1  ;;  %v907_v36 = vmul.f32 %v1280_v6, %v543_v1  ;;  %v963_v61 = vadd.f32 %v962_v35, %v961_v46  ;;  %v1062_v48 = vadd.f32 %v1061_v45, %v1060_v42 }
 0x124   : > { %714 = vst.msk [vmem:[%s1694_s7 + $0x7c] sm:$0xf] %vm682_vm1, %v1319_v23  ;;  %v1282_v32 = vsel %vm813_vm5, 1.0, %v1459_v44  ;;  %v964_v18 = vsel %vm910_vm4, %v905_v53, 0.0  ;;  %v908_v12 = vmul.f32 %v1887_v25, %v548_v52  ;;  %v966_v21 = vsel %vm910_vm4, %v906_v39, 0.0 }
 0x125   : > { %v1008_v34 = vmul.f32 %v906_v39, %v540_v63  ;;  %712 = vst.msk [vmem:[%s1694_s7 + $0x74] sm:$0xf] %vm682_vm1, %v1317_v30  ;;  %v1064_v8 = vadd.f32 %v1063_v33, %v1062_v48  ;;  %v965_v17 = vadd.f32 %v964_v18, %v963_v61  ;;  %v1065_v24 = vsel %vm910_vm4, %v1007_v22, 0.0 }
 0x126   : > { %v909_v41 = vmul.f32 %v1282_v32, %v551_v40  ;;  %v1009_v56 = vmul.f32 %v907_v36, %v543_v1  ;;  %v1010_v26 = vmul.f32 %v908_v12, %v548_v52  ;;  %v968_v2 = vsel %vm910_vm4, %v907_v36, 0.0 }
 0x127   : > { %v967_v0 = vadd.f32 %v966_v21, %v965_v17  ;;  %v1066_v60 = vadd.f32 %v1065_v24, %v1064_v8  ;;  %v1067_v44 = vsel %vm910_vm4, %v1008_v34, 0.0  ;;  %v970_v9 = vsel %vm910_vm4, %v908_v12, 0.0 }
 0x128   : > { %v1011_v38 = vmul.f32 %v909_v41, %v551_v40  ;;  %v1069_v43 = vsel %vm910_vm4, %v1009_v56, 0.0  ;;  %v1071_v28 = vsel %vm910_vm4, %v1010_v26, 0.0  ;;  %v972_v54 = vsel %vm910_vm4, %v909_v41, 0.0 }
 0x129   : > { %v1068_v27 = vadd.f32 %v1067_v44, %v1066_v60  ;;  %v969_v25 = vadd.f32 %v968_v2, %v967_v0  ;;  %vm1081_vm1 = vcmask 1040384   ;;  %v1460_v3 = vmov (!%p1283_p4), 0.0  }
 0x12a   : > { %v1073_v47 = vsel %vm910_vm4, %v1011_v38, 0.0  ;;  %1088 = vst.msk [vmem:[#allocation2] sm:$0x3] (!%p1283_p4), %vm1087_vm6, %v1460_v3 }
 0x12b   : > { %v971_v13 = vadd.f32 %v970_v9, %v969_v25  ;;  %v1070_v59 = vadd.f32 %v1069_v43, %v1068_v27 }
 0x12d   : > { %v973_v50 = vadd.f32 %v972_v54, %v971_v13  ;;  %v1072_v10 = vadd.f32 %v1071_v28, %v1070_v59 }
 0x12f   : > { %v974_v31 = vrot.slane %v973_v50, 4  ;;  %v1074_v52 = vadd.f32 %v1073_v47, %v1072_v10 }
 0x131   : > { %v975_v58 = vadd.f32 %v974_v31, %v973_v50  ;;  %v1075_v20 = vrot.slane %v1074_v52, 4 }
 0x133   : > { %v976_v7 = vrot.slane %v975_v58, 2  ;;  %v1076_v16 = vadd.f32 %v1075_v20, %v1074_v52 }
 0x135   : > { %v977_v37 = vadd.f32 %v976_v7, %v975_v58  ;;  %v1077_v5 = vrot.slane %v1076_v16, 2 }
 0x137   : > { %v978_v55 = vrot.slane %v977_v37, 1  ;;  %v1078_v63 = vadd.f32 %v1077_v5, %v1076_v16  ;;  %1086 = sbr.rel (%p1283_p4) target bundleno = 318 (0x13e), region = 36 }
 0x139   : > { %v1079_v19 = vrot.slane %v1078_v63, 1  ;;  %v979_v51 = vadd.f32 %v978_v55, %v977_v37 }
 0x13b   : > { %v1080_v11 = vadd.f32 %v1079_v19, %v1078_v63 }
 0x13d   : > { %v1082_v6 = vsel %vm1081_vm1, %v979_v51, %v1080_v11 }
 0x13e PF: > { %v1089_v53 = vld [vmem:[#allocation2] sm:$0x3]  ;;  %vm1091_vm4 = vcmask 58368   ;;  %p1389_p5 = scmp.eq.s32.totalorder %s1493_s16, 1  ;;  %s1461_s8 = smov [#allocation2]  }
 0x13f   : > { %v1090_v49 = vadd.f32 %v1089_v53, %v1082_v6  ;;  %s1109_s9 = sshll.u32 %s1461_s8, 4  ;;  %s1110_s9 = int_to_ptr.vmem [resolvable:$true] %s1109_s9 }
 0x140   : > { %s1421_s10 = scalar_lea.vmem %s1110_s9, 32  ;;  %p1428_p9 = scmp.lt.s32.totalorder %s1110_s9, %s1110_s9 }
 0x141   : > { %1092 = vst.msk [vmem:[#allocation2] sm:$0x3] %vm1091_vm4, %v1090_v49  ;;  %p1422_p6 = scmp.ne.s32.totalorder %s1110_s9, %s1421_s10  ;;  %p1429_p10 = scmp.lt.s32.totalorder %s1421_s10, %s1421_s10 }
 0x143   : > { %p1423_p7 = pnand %p1422_p6, %p1389_p5  ;;  %p1430_p11 = por %p1429_p10, %p1428_p9 }
 0x145   : > { %p1424_p8 = pneg %p1423_p7 }
 0x147   : > { %p1431_p12 = pnand %p1430_p11, %p1424_p8 }
 0x149   : > { %1434 = shalt.err (!%p1431_p12)
}
 0x14a   : > { %s1435_s13 = scalar_lea.hbm %s2025_s4, 32 }
 0x14b   : > { %p1436_p13 = scmp.ne.s32.totalorder %s2025_s4, %s1435_s13  ;;  %p1441_p2 = scmp.lt.u32.totalorder %s1435_s13, %s2025_s4 }
 0x14d   : > { %p1437_p0 = pnand %p1436_p13, %p1389_p5 }
 0x14f   : > { %p1438_p1 = pneg %p1437_p0 }
 0x151   : > { %p1443_p3 = pnand %p1441_p2, %p1438_p1 }
 0x153   : > { %1446 = shalt.err (!%p1443_p3)
}
 0x154   : > { %1386 = dma.vmem_to_hbm [thread:$0]  (%p1389_p5), %s1110_s9, 32, %s2025_s4, [#allocation3]  }
 0x155   : > { %1452 = dma.done.wait (%p1389_p5), [#allocation3], 32  }
 0x156   : > { %1454 = vsyncadd (%p1389_p5), [#allocation3], 4294967264 }
 0x157 PF: > { %s16_s15 = sadd.s32 1, %s1457_s15  }
 0x158   : > { %p13_p4 = scmp.ge.s32.totalorder %s16_s15, 4  }
 0x15a   :  { %15 = sbr.rel (!%p13_p4) target bundleno = 1 (0x1), region = 75 }
 0x161   :  { %1130 = vsyncpa [#allocation3], 1 }
 0x162   :  { %1132 = vsyncpa [#allocation3 + $0x1], 1 }

</bundles_post_ra>
